<compile_context>
chip_gen: v6e
topology: v6e:2x2x1
jax: 0.10.0
libtpu: 0.0.40
codegen_flags: <defaults>
</compile_context>

<pallas_src>
import jax
import jax.numpy as jnp
from jax import lax
from jax.experimental import pallas as pl
from jax.experimental.pallas import tpu as pltpu  # noqa: F401  (kept for TPU-specific tuning hooks)

_OC = 576       # conv output channels == linear input features
_OUT = 9        # linear output features
_LANE = 128     # lane-dense padded output width


def _testmodel_kernel(x_ref, w1_ref, b1_ref, w2_ref, b2_ref, o_ref):
    # x_ref : (1, C*K)        flattened conv input (c-major, k-minor)
    # w1_ref: (576, C*K)      conv weight in natural (flattened) layout
    # b1_ref: (1, 576)
    # w2_ref: (128, 576)      linear weight, zero-padded 9 -> 128 output rows
    # b2_ref: (1, 128)        linear bias,   zero-padded 9 -> 128
    # o_ref : (1, 128)        lane-dense output tile (valid data in [:, :9])

    # h = relu(x @ W1^T + b1) : (1, 576); contraction on last axes of both.
    h = lax.dot_general(
        x_ref[...], w1_ref[...],
        dimension_numbers=(((1,), (1,)), ((), ())),
        preferred_element_type=jnp.float32,
    )
    h = jnp.maximum(h + b1_ref[...], 0.0)

    # y = h @ W2p^T + b2p : (1, 128); lane-dense store, no masked vst.
    y = lax.dot_general(
        h, w2_ref[...],
        dimension_numbers=(((1,), (1,)), ((), ())),
        preferred_element_type=jnp.float32,
    )
    o_ref[...] = (y + b2_ref[...]).astype(o_ref.dtype)


def prepare_params(conv_w, conv_b, lin_w, lin_b):
    """One-time (init) weight preparation: flatten conv weight (no transpose),
    zero-pad the linear weight/bias to a lane-dense 128-wide output."""
    oc, c, k = conv_w.shape
    assert oc == _OC and k == 4
    w1 = conv_w.reshape(oc, c * k)                               # (576, C*4), natural layout
    b1 = conv_b.reshape(1, oc)                                   # (1, 576)
    w2p = jnp.zeros((_LANE, oc), lin_w.dtype).at[:_OUT, :].set(lin_w)   # (128, 576)
    b2p = jnp.zeros((1, _LANE), lin_b.dtype).at[:, :_OUT].set(lin_b)    # (1, 128)
    return w1, b1, w2p, b2p


@jax.jit
def test_model_forward(x, w1, b1, w2p, b2p):
    """x: (1, C, 4) f32; prepared params from prepare_params(). Returns (1, 9) f32."""
    n, c, k = x.shape
    assert n == 1 and k == 4, "view(1,-1)+Linear(576,9) requires N=1, L=4"
    x_flat = x.reshape(1, c * k)                                 # (1, C*4) — view, fused in jit

    flops = 2 * (c * k * _OC + _OC * _OUT)
    bytes_accessed = 4 * (c * k + _OC * c * k + _OC + _LANE * _OC + _LANE + _LANE)

    out_padded = pl.pallas_call(
        _testmodel_kernel,
        out_shape=jax.ShapeDtypeStruct((1, _LANE), jnp.float32),
        in_specs=[
            pl.BlockSpec(x_flat.shape, lambda: (0, 0)),
            pl.BlockSpec(w1.shape, lambda: (0, 0)),
            pl.BlockSpec(b1.shape, lambda: (0, 0)),
            pl.BlockSpec(w2p.shape, lambda: (0, 0)),
            pl.BlockSpec(b2p.shape, lambda: (0, 0)),
        ],
        out_specs=pl.BlockSpec((1, _LANE), lambda: (0, 0)),
        cost_estimate=pl.CostEstimate(
            flops=flops, transcendentals=0, bytes_accessed=bytes_accessed),
    )(x_flat, w1, b1, w2p, b2p)

    return out_padded[:, :_OUT]                                  # (1, 9)


def _reference(x, conv_w, conv_b, lin_w, lin_b):
    # Pure-JAX reference mirroring the PyTorch forward (N=1, L=K=4).
    conv_out = jnp.einsum("nck,ock->no", x, conv_w) + conv_b     # (1, 576)
    h = jnp.maximum(conv_out, 0.0).reshape(1, -1)                # view(1, -1)
    return h @ lin_w.T + lin_b                                   # (1, 9)


if __name__ == "__main__":
    num_points = 16  # conv input channels
    key = jax.random.PRNGKey(0)
    k_x, k_w1, k_b1, k_w2, k_b2 = jax.random.split(key, 5)

    # Input: (N=1, C=num_points, L=4) — the only shape the PyTorch forward accepts.
    x = jax.random.normal(k_x, (1, num_points, 4), dtype=jnp.float32)

    # Deterministic synthetic parameters (shapes from the module's __init__).
    conv_w = jax.random.normal(k_w1, (_OC, num_points, 4), dtype=jnp.float32) * 0.05
    conv_b = jax.random.normal(k_b1, (_OC,), dtype=jnp.float32) * 0.05
    lin_w = jax.random.normal(k_w2, (_OUT, _OC), dtype=jnp.float32) * 0.05
    lin_b = jax.random.normal(k_b2, (_OUT,), dtype=jnp.float32) * 0.05

    # One-time weight preparation (init-time, off the hot path).
    w1, b1, w2p, b2p = prepare_params(conv_w, conv_b, lin_w, lin_b)

    out = test_model_forward(x, w1, b1, w2p, b2p)
    out = jax.block_until_ready(out)

    ref = _reference(x, conv_w, conv_b, lin_w, lin_b)
    assert out.shape == (1, _OUT)
    assert jnp.allclose(out, ref, atol=1e-4, rtol=1e-4), "mismatch vs reference"

    print("KERNEL_OK")
</pallas_src>

<mosaic_0001>
module attributes {stable_mosaic.version = 11 : i64} {
  func.func @_testmodel_kernel(%arg0: memref<1x64xf32, #tpu.memory_space<vmem>>, %arg1: memref<576x64xf32, #tpu.memory_space<vmem>>, %arg2: memref<1x576xf32, #tpu.memory_space<vmem>>, %arg3: memref<128x576xf32, #tpu.memory_space<vmem>>, %arg4: memref<1x128xf32, #tpu.memory_space<vmem>>, %arg5: memref<1x128xf32, #tpu.memory_space<vmem>>) attributes {dimension_semantics = [], scalar_prefetch = 0 : i64, scratch_operands = 0 : i64, tpu.core_type = #tpu.core_type<tc>} {
    %c0 = arith.constant 0 : index
    %c0_0 = arith.constant 0 : index
    %0 = vector.load %arg0[%c0, %c0_0] : memref<1x64xf32, #tpu.memory_space<vmem>>, vector<1x64xf32>
    %c0_1 = arith.constant 0 : index
    %c0_2 = arith.constant 0 : index
    %1 = vector.load %arg1[%c0_1, %c0_2] : memref<576x64xf32, #tpu.memory_space<vmem>>, vector<576x64xf32>
    %cst = arith.constant dense<0.000000e+00> : vector<1x576xf32>
    %2 = tpu.matmul %0, %1, %cst {dimension_numbers = #tpu.dot_dimension_numbers<[1], [1], [0], [0], [0, 0, 1, 0], [], []>} : vector<1x64xf32>, vector<576x64xf32>, vector<1x576xf32> -> vector<1x576xf32>
    %c0_3 = arith.constant 0 : index
    %c0_4 = arith.constant 0 : index
    %3 = vector.load %arg2[%c0_3, %c0_4] : memref<1x576xf32, #tpu.memory_space<vmem>>, vector<1x576xf32>
    %4 = arith.addf %2, %3 : vector<1x576xf32>
    %cst_5 = arith.constant 0.000000e+00 : f32
    %5 = vector.broadcast %cst_5 : f32 to vector<1x576xf32>
    %6 = arith.maximumf %4, %5 : vector<1x576xf32>
    %c0_6 = arith.constant 0 : index
    %c0_7 = arith.constant 0 : index
    %7 = vector.load %arg3[%c0_6, %c0_7] : memref<128x576xf32, #tpu.memory_space<vmem>>, vector<128x576xf32>
    %cst_8 = arith.constant dense<0.000000e+00> : vector<1x128xf32>
    %8 = tpu.matmul %6, %7, %cst_8 {dimension_numbers = #tpu.dot_dimension_numbers<[1], [1], [0], [0], [0, 0, 1, 0], [], []>} : vector<1x576xf32>, vector<128x576xf32>, vector<1x128xf32> -> vector<1x128xf32>
    %c0_9 = arith.constant 0 : index
    %c0_10 = arith.constant 0 : index
    %9 = vector.load %arg4[%c0_9, %c0_10] : memref<1x128xf32, #tpu.memory_space<vmem>>, vector<1x128xf32>
    %10 = arith.addf %8, %9 : vector<1x128xf32>
    %c0_11 = arith.constant 0 : index
    %c0_12 = arith.constant 0 : index
    %11 = vector.load %arg5[%c0_11, %c0_12] : memref<1x128xf32, #tpu.memory_space<vmem>>, vector<1x128xf32>
    tpu.vector_store %arg5[%c0_11, %c0_12], %10 {strides = array<i32>} : memref<1x128xf32, #tpu.memory_space<vmem>>, vector<1x128xf32>,
    return
  }
}

</mosaic_0001>

<bundles_post_ra>
// kernel: test_model_forward.1
= control target key start
LH: loop header
LB: loop body
LE: loop exit
PB: predicated region body
PF: predicated region fallthrough
CT: control target
= control target key end

     0   :  { %vm121_vm0 = vcmask 523264   ;;  %s1824_s0 = inlined_call_operand.vmem [shape: f32[1,64], index: 0, kind: input, shape index: {}]   ;;  %s1825_s1 = inlined_call_operand.vmem [shape: f32[576,64], index: 1, kind: input, shape index: {}]   ;;  %s1826_s2 = inlined_call_operand.vmem [shape: f32[1,576], index: 2, kind: input, shape index: {}]   ;;  %s1827_s3 = inlined_call_operand.vmem [shape: f32[128,576], index: 3, kind: input, shape index: {}]   ;;  %s1828_s4 = inlined_call_operand.vmem [shape: f32[1,128], index: 4, kind: input, shape index: {}]   ;;  %s1829_s5 = inlined_call_operand.hbm [shape: f32[1,128], index: 5, kind: output, shape index: {}]  }
   0x1   :  { %v53_v0 = vld [vmem:[%s1825_s1 + $0xf8] sm:$0xff]  ;;  %v52_v4 = vld [vmem:[%s1825_s1 + $0xf0] sm:$0xff]  ;;  %v51_v8 = vld [vmem:[%s1825_s1 + $0xe8] sm:$0xff] }
   0x2   :  { %v37_v1 = vld [vmem:[%s1825_s1 + $0x78] sm:$0xff]  ;;  %1007 = vmatprep.subr.msk.mxu0 %vm121_vm0, %v53_v0  ;;  %v84_v5 = vld [vmem:[%s1825_s1 + $0x1f0] sm:$0xff]  ;;  %v83_v9 = vld [vmem:[%s1825_s1 + $0x1e8] sm:$0xff] }
   0x3   :  { %v85_v2 = vld [vmem:[%s1825_s1 + $0x1f8] sm:$0xff]  ;;  %1008 = vmatpush3.xpose.msk.msra.mxu0 %vm121_vm0, %v37_v1  ;;  %v36_v6 = vld [vmem:[%s1825_s1 + $0x70] sm:$0xff]  ;;  %v35_v10 = vld [vmem:[%s1825_s1 + $0x68] sm:$0xff] }
   0x4   :  { %1041 = vmatprep.subr.msk.mxu1 %vm121_vm0, %v85_v2  ;;  %v69_v3 = vld [vmem:[%s1825_s1 + $0x178] sm:$0xff]  ;;  %1009 = vmatprep.subr.msk.mxu0 %vm121_vm0, %v52_v4  ;;  %v68_v7 = vld [vmem:[%s1825_s1 + $0x170] sm:$0xff]  ;;  %v67_v11 = vld [vmem:[%s1825_s1 + $0x168] sm:$0xff] }
   0x5   :  { %1042 = vmatpush3.xpose.msk.msra.mxu1 %vm121_vm0, %v69_v3  ;;  %v50_v12 = vld [vmem:[%s1825_s1 + $0xe0] sm:$0xff]  ;;  %v49_v16 = vld [vmem:[%s1825_s1 + $0xd8] sm:$0xff]  ;;  %v48_v20 = vld [vmem:[%s1825_s1 + $0xd0] sm:$0xff] }
   0x6   :  { %1043 = vmatprep.subr.msk.mxu1 %vm121_vm0, %v84_v5  ;;  %v82_v13 = vld [vmem:[%s1825_s1 + $0x1e0] sm:$0xff]  ;;  %v81_v17 = vld [vmem:[%s1825_s1 + $0x1d8] sm:$0xff]  ;;  %v80_v21 = vld [vmem:[%s1825_s1 + $0x1d0] sm:$0xff] }
   0x7   :  { %1010 = vmatpush3.xpose.msk.msra.mxu0 %vm121_vm0, %v36_v6  ;;  %v34_v14 = vld [vmem:[%s1825_s1 + $0x60] sm:$0xff]  ;;  %v33_v18 = vld [vmem:[%s1825_s1 + $0x58] sm:$0xff]  ;;  %v32_v22 = vld [vmem:[%s1825_s1 + $0x50] sm:$0xff] }
   0x8   :  { %1011 = vmatprep.subr.msk.mxu0 %vm121_vm0, %v51_v8  ;;  %v66_v15 = vld [vmem:[%s1825_s1 + $0x160] sm:$0xff]  ;;  %v65_v19 = vld [vmem:[%s1825_s1 + $0x158] sm:$0xff]  ;;  %v64_v23 = vld [vmem:[%s1825_s1 + $0x150] sm:$0xff] }
   0x9   :  { %1044 = vmatpush3.xpose.msk.msra.mxu1 %vm121_vm0, %v68_v7  ;;  %v47_v24 = vld [vmem:[%s1825_s1 + $0xc8] sm:$0xff]  ;;  %v1316_v26 = vld [vmem:[%s1824_s0] sm:$0x1]  ;;  %v45_v33 = vld [vmem:[%s1825_s1 + $0xb8] sm:$0xff] }
   0xa   :  { %1045 = vmatprep.subr.msk.mxu1 %vm121_vm0, %v83_v9  ;;  %v79_v25 = vld [vmem:[%s1825_s1 + $0x1c8] sm:$0xff]  ;;  %v46_v29 = vld [vmem:[%s1825_s1 + $0xc0] sm:$0xff]  ;;  %1039 = vmatprep.mubr.msk.f32.mxu0 %vm121_vm0, %v1316_v26  ;;  %v77_v34 = vld [vmem:[%s1825_s1 + $0x1b8] sm:$0xff] }
   0xb   :  { %1012 = vmatpush3.xpose.msk.msra.mxu0 %vm121_vm0, %v35_v10  ;;  %v31_v27 = vld [vmem:[%s1825_s1 + $0x48] sm:$0xff]  ;;  %v78_v30 = vld [vmem:[%s1825_s1 + $0x1c0] sm:$0xff]  ;;  %1073 = vmatprep.mubr.msk.f32.mxu1 %vm121_vm0, %v1316_v26  ;;  %v29_v35 = vld [vmem:[%s1825_s1 + $0x38] sm:$0xff] }
   0xc   :  { %1013 = vmatprep.subr.msk.mxu0 %vm121_vm0, %v50_v12  ;;  %v63_v28 = vld [vmem:[%s1825_s1 + $0x148] sm:$0xff]  ;;  %v30_v31 = vld [vmem:[%s1825_s1 + $0x40] sm:$0xff]  ;;  %v61_v36 = vld [vmem:[%s1825_s1 + $0x138] sm:$0xff] }
   0xd   :  { %1046 = vmatpush3.xpose.msk.msra.mxu1 %vm121_vm0, %v67_v11  ;;  %v62_v32 = vld [vmem:[%s1825_s1 + $0x140] sm:$0xff]  ;;  %v44_v37 = vld [vmem:[%s1825_s1 + $0xb0] sm:$0xff]  ;;  %v43_v41 = vld [vmem:[%s1825_s1 + $0xa8] sm:$0xff] }
   0xe   :  { %1047 = vmatprep.subr.msk.mxu1 %vm121_vm0, %v82_v13  ;;  %v76_v38 = vld [vmem:[%s1825_s1 + $0x1b0] sm:$0xff]  ;;  %v75_v42 = vld [vmem:[%s1825_s1 + $0x1a8] sm:$0xff]  ;;  %v42_v45 = vld [vmem:[%s1825_s1 + $0xa0] sm:$0xff] }
   0xf   :  { %1014 = vmatpush3.xpose.msk.msra.mxu0 %vm121_vm0, %v34_v14  ;;  %v28_v39 = vld [vmem:[%s1825_s1 + $0x30] sm:$0xff]  ;;  %v27_v43 = vld [vmem:[%s1825_s1 + $0x28] sm:$0xff]  ;;  %v74_v46 = vld [vmem:[%s1825_s1 + $0x1a0] sm:$0xff] }
  0x10   :  { %1015 = vmatprep.subr.msk.mxu0 %vm121_vm0, %v49_v16  ;;  %v60_v40 = vld [vmem:[%s1825_s1 + $0x130] sm:$0xff]  ;;  %v59_v44 = vld [vmem:[%s1825_s1 + $0x128] sm:$0xff]  ;;  %v26_v47 = vld [vmem:[%s1825_s1 + $0x20] sm:$0xff] }
  0x11   :  { %1048 = vmatpush3.xpose.msk.msra.mxu1 %vm121_vm0, %v66_v15  ;;  %v58_v48 = vld [vmem:[%s1825_s1 + $0x120] sm:$0xff] }
  0x12   :  { %1049 = vmatprep.subr.msk.mxu1 %vm121_vm0, %v81_v17 }
  0x13   :  { %1016 = vmatpush3.xpose.msk.msra.mxu0 %vm121_vm0, %v33_v18 }
  0x14   :  { %1017 = vmatprep.subr.msk.mxu0 %vm121_vm0, %v48_v20 }
  0x15   :  { %1050 = vmatpush3.xpose.msk.msra.mxu1 %vm121_vm0, %v65_v19 }
  0x16   :  { %1051 = vmatprep.subr.msk.mxu1 %vm121_vm0, %v80_v21 }
  0x17   :  { %1018 = vmatpush3.xpose.msk.msra.mxu0 %vm121_vm0, %v32_v22 }
  0x18   :  { %1019 = vmatprep.subr.msk.mxu0 %vm121_vm0, %v47_v24 }
  0x19   :  { %1052 = vmatpush3.xpose.msk.msra.mxu1 %vm121_vm0, %v64_v23 }
  0x1a   :  { %1053 = vmatprep.subr.msk.mxu1 %vm121_vm0, %v79_v25 }
  0x1b   :  { %1020 = vmatpush3.xpose.msk.msra.mxu0 %vm121_vm0, %v31_v27 }
  0x1c   :  { %1021 = vmatprep.subr.msk.mxu0 %vm121_vm0, %v46_v29 }
  0x1d   :  { %1054 = vmatpush3.xpose.msk.msra.mxu1 %vm121_vm0, %v63_v28 }
  0x1e   :  { %1055 = vmatprep.subr.msk.mxu1 %vm121_vm0, %v78_v30 }
  0x1f   :  { %1022 = vmatpush3.xpose.msk.msra.mxu0 %vm121_vm0, %v30_v31 }
  0x20   :  { %1023 = vmatprep.subr.msk.mxu0 %vm121_vm0, %v45_v33 }
  0x21   :  { %1056 = vmatpush3.xpose.msk.msra.mxu1 %vm121_vm0, %v62_v32 }
  0x22   :  { %1057 = vmatprep.subr.msk.mxu1 %vm121_vm0, %v77_v34 }
  0x23   :  { %1024 = vmatpush3.xpose.msk.msra.mxu0 %vm121_vm0, %v29_v35 }
  0x24   :  { %1025 = vmatprep.subr.msk.mxu0 %vm121_vm0, %v44_v37 }
  0x25   :  { %1058 = vmatpush3.xpose.msk.msra.mxu1 %vm121_vm0, %v61_v36 }
  0x26   :  { %1059 = vmatprep.subr.msk.mxu1 %vm121_vm0, %v76_v38 }
  0x27   :  { %1026 = vmatpush3.xpose.msk.msra.mxu0 %vm121_vm0, %v28_v39 }
  0x28   :  { %1027 = vmatprep.subr.msk.mxu0 %vm121_vm0, %v43_v41 }
  0x29   :  { %1060 = vmatpush3.xpose.msk.msra.mxu1 %vm121_vm0, %v60_v40 }
  0x2a   :  { %1061 = vmatprep.subr.msk.mxu1 %vm121_vm0, %v75_v42 }
  0x2b   :  { %1028 = vmatpush3.xpose.msk.msra.mxu0 %vm121_vm0, %v27_v43 }
  0x2c   :  { %1029 = vmatprep.subr.msk.mxu0 %vm121_vm0, %v42_v45 }
  0x2d   :  { %1062 = vmatpush3.xpose.msk.msra.mxu1 %vm121_vm0, %v59_v44 }
  0x2e   :  { %1063 = vmatprep.subr.msk.mxu1 %vm121_vm0, %v74_v46 }
  0x2f   :  { %10 = vsyncpa [#allocation3], 0  ;;  %v41_v49 = vld [vmem:[%s1825_s1 + $0x98] sm:$0xff]  ;;  %1030 = vmatpush3.xpose.msk.msra.mxu0 %vm121_vm0, %v26_v47  ;;  %v40_v53 = vld [vmem:[%s1825_s1 + $0x90] sm:$0xff]  ;;  %v1180_v2 = vmov 0.0   ;;  %vm1181_vm1 = vmmov 0  }
  0x30   :  { %v73_v50 = vld [vmem:[%s1825_s1 + $0x198] sm:$0xff]  ;;  %1031 = vmatprep.subr.msk.mxu0 %vm121_vm0, %v41_v49  ;;  %v72_v54 = vld [vmem:[%s1825_s1 + $0x190] sm:$0xff]  ;;  %v39_v57 = vld [vmem:[%s1825_s1 + $0x88] sm:$0xff]  ;;  %s1182_s11 = smov [#allocation2]  }
  0x31   :  { %1064 = vmatpush3.xpose.msk.msra.mxu1 %vm121_vm0, %v58_v48  ;;  %v25_v51 = vld [vmem:[%s1825_s1 + $0x18] sm:$0xff]  ;;  %v24_v55 = vld [vmem:[%s1825_s1 + $0x10] sm:$0xff]  ;;  %v71_v58 = vld [vmem:[%s1825_s1 + $0x188] sm:$0xff]  ;;  %s907_s12 = sshll.u32 %s1182_s11, 4  ;;  %s908_s12 = int_to_ptr.vmem [resolvable:$true] %s907_s12 }
  0x32   :  { %1065 = vmatprep.subr.msk.mxu1 %vm121_vm0, %v73_v50  ;;  %v57_v52 = vld [vmem:[%s1825_s1 + $0x118] sm:$0xff]  ;;  %v56_v56 = vld [vmem:[%s1825_s1 + $0x110] sm:$0xff]  ;;  %v23_v59 = vld [vmem:[%s1825_s1 + $0x8] sm:$0xff]  ;;  %s1162_s13 = scalar_lea.vmem %s908_s12, 32  ;;  %p1163_p1 = scmp.lt.s32.totalorder %s908_s12, %s908_s12 }
  0x33   :  { %1032 = vmatpush3.xpose.msk.msra.mxu0 %vm121_vm0, %v25_v51  ;;  %v55_v60 = vld [vmem:[%s1825_s1 + $0x108] sm:$0xff]  ;;  %v38_v61 = vld [vmem:[%s1825_s1 + $0x80] sm:$0xff]  ;;  %v93_v3 = vld [vmem:[%s1825_s1 + $0x238] sm:$0xff] }
  0x34   :  { %1033 = vmatprep.subr.msk.mxu0 %vm121_vm0, %v40_v53  ;;  %v70_v62 = vld [vmem:[%s1825_s1 + $0x180] sm:$0xff]  ;;  %v633_v4 = vld [vmem:[%s1827_s3 + $0x258] sm:$0xff]  ;;  %v92_v6 = vld [vmem:[%s1825_s1 + $0x230] sm:$0xff] }
  0x35   :  { %1066 = vmatpush3.xpose.msk.msra.mxu1 %vm121_vm0, %v57_v52  ;;  %v22_v63 = vld [vmem:[%s1825_s1] sm:$0xff]  ;;  %v629_v5 = vld [vmem:[%s1827_s3 + $0x238] sm:$0xff]  ;;  %v628_v7 = vld [vmem:[%s1827_s3 + $0x230] sm:$0xff] }
  0x36   :  { %1067 = vmatprep.subr.msk.mxu1 %vm121_vm0, %v72_v54  ;;  %v54_v0 = vld [vmem:[%s1825_s1 + $0x100] sm:$0xff]  ;;  %v624_v8 = vld [vmem:[%s1827_s3 + $0x210] sm:$0xff]  ;;  %v91_v9 = vld [vmem:[%s1825_s1 + $0x228] sm:$0xff] }
  0x37   :  { %1034 = vmatpush3.xpose.msk.msra.mxu0 %vm121_vm0, %v24_v55  ;;  %v634_v1 = vld [vmem:[%s1827_s3 + $0x260] sm:$0xff]  ;;  %v623_v10 = vld [vmem:[%s1827_s3 + $0x208] sm:$0xff]  ;;  %v89_v15 = vld [vmem:[%s1825_s1 + $0x218] sm:$0xff] }
  0x38   :  { %1035 = vmatprep.subr.msk.mxu0 %vm121_vm0, %v39_v57  ;;  %v619_v11 = vld [vmem:[%s1827_s3 + $0x1e8] sm:$0xff]  ;;  %v90_v12 = vld [vmem:[%s1825_s1 + $0x220] sm:$0xff]  ;;  %v613_v16 = vld [vmem:[%s1827_s3 + $0x1b8] sm:$0xff] }
  0x39   :  { %1068 = vmatpush3.xpose.msk.msra.mxu1 %vm121_vm0, %v56_v56  ;;  %v618_v13 = vld [vmem:[%s1827_s3 + $0x1e0] sm:$0xff]  ;;  %v609_v17 = vld [vmem:[%s1827_s3 + $0x198] sm:$0xff]  ;;  %v88_v18 = vld [vmem:[%s1825_s1 + $0x210] sm:$0xff] }
  0x3a   :  { %1069 = vmatprep.subr.msk.mxu1 %vm121_vm0, %v71_v58  ;;  %v614_v14 = vld [vmem:[%s1827_s3 + $0x1c0] sm:$0xff]  ;;  %v608_v19 = vld [vmem:[%s1827_s3 + $0x190] sm:$0xff]  ;;  %v87_v21 = vld [vmem:[%s1825_s1 + $0x208] sm:$0xff] }
  0x3b   :  { %1036 = vmatpush3.xpose.msk.msra.mxu0 %vm121_vm0, %v23_v59  ;;  %v604_v20 = vld [vmem:[%s1827_s3 + $0x170] sm:$0xff]  ;;  %v603_v22 = vld [vmem:[%s1827_s3 + $0x168] sm:$0xff]  ;;  %v86_v24 = vld [vmem:[%s1825_s1 + $0x200] sm:$0xff] }
  0x3c   :  { %1037 = vmatprep.subr.msk.mxu0 %vm121_vm0, %v38_v61  ;;  %v599_v23 = vld [vmem:[%s1827_s3 + $0x148] sm:$0xff]  ;;  %v636_v25 = vld [vmem:[%s1827_s3 + $0x270] sm:$0xff]  ;;  %v598_v27 = vld [vmem:[%s1827_s3 + $0x140] sm:$0xff] }
  0x3d   :  { %1070 = vmatpush3.xpose.msk.msra.mxu1 %vm121_vm0, %v55_v60  ;;  %v594_v28 = vld [vmem:[%s1827_s3 + $0x120] sm:$0xff]  ;;  %v635_v29 = vld [vmem:[%s1827_s3 + $0x268] sm:$0xff]  ;;  %v593_v31 = vld [vmem:[%s1827_s3 + $0x118] sm:$0xff] }
  0x3e   :  { %1071 = vmatprep.subr.msk.mxu1 %vm121_vm0, %v70_v62  ;;  %v631_v30 = vld [vmem:[%s1827_s3 + $0x248] sm:$0xff]  ;;  %v589_v32 = vld [vmem:[%s1827_s3 + $0xf8] sm:$0xff]  ;;  %v630_v33 = vld [vmem:[%s1827_s3 + $0x240] sm:$0xff] }
  0x3f   :  { %1038 = vmatpush3.xpose.msk.msra.mxu0 %vm121_vm0, %v22_v63  ;;  %v626_v34 = vld [vmem:[%s1827_s3 + $0x220] sm:$0xff]  ;;  %v584_v35 = vld [vmem:[%s1827_s3 + $0xd0] sm:$0xff]  ;;  %v625_v36 = vld [vmem:[%s1827_s3 + $0x218] sm:$0xff] }
  0x40   :  { %1101 = vmatprep.subr.mxu0 %v1180_v2  ;;  %v621_v37 = vld [vmem:[%s1827_s3 + $0x1f8] sm:$0xff]  ;;  %v583_v38 = vld [vmem:[%s1827_s3 + $0xc8] sm:$0xff]  ;;  %v620_v40 = vld [vmem:[%s1827_s3 + $0x1f0] sm:$0xff] }
  0x41   :  { %1072 = vmatpush3.xpose.msk.msra.mxu1 %vm121_vm0, %v54_v0  ;;  %v579_v39 = vld [vmem:[%s1827_s3 + $0xa8] sm:$0xff]  ;;  %v616_v41 = vld [vmem:[%s1827_s3 + $0x1d0] sm:$0xff]  ;;  %v578_v42 = vld [vmem:[%s1827_s3 + $0xa0] sm:$0xff] }
  0x42   :  { %690 = vmatprep.subr.mxu1 %v634_v1  ;;  %1040 = vmatmul.mubr.msk.f32.vlgmr.msra.gmra.mxu0 %vm121_vm0, %v1316_v26  ;;  %v574_v43 = vld [vmem:[%s1827_s3 + $0x80] sm:$0xff]  ;;  %v615_v44 = vld [vmem:[%s1827_s3 + $0x1c8] sm:$0xff]  ;;  %v573_v46 = vld [vmem:[%s1827_s3 + $0x78] sm:$0xff] }
  0x43   :  { %1102 = vmatpush3.xpose.msk.msra.mxu0 %vm121_vm0, %v93_v3  ;;  %1117 = vmatprep.mubr.msk.f32.mxu0 %vm1181_vm1, %v1180_v2  ;;  %v611_v45 = vld [vmem:[%s1827_s3 + $0x1a8] sm:$0xff]  ;;  %v569_v47 = vld [vmem:[%s1827_s3 + $0x58] sm:$0xff]  ;;  %v610_v48 = vld [vmem:[%s1827_s3 + $0x1a0] sm:$0xff] }
  0x44   :  { %1074 = vmatmul.mubr.msk.f32.vlgmr.msra.gmra.mxu1 %vm121_vm0, %v1316_v26  ;;  %1103 = vmatprep.subr.mxu0 %v1180_v2  ;;  %v606_v49 = vld [vmem:[%s1827_s3 + $0x180] sm:$0xff]  ;;  %v568_v50 = vld [vmem:[%s1827_s3 + $0x50] sm:$0xff]  ;;  %v605_v52 = vld [vmem:[%s1827_s3 + $0x178] sm:$0xff] }
  0x45   :  { %691 = vmatpush1.xpose.msra.mxu1 %v633_v4  ;;  %v564_v51 = vld [vmem:[%s1827_s3 + $0x30] sm:$0xff]  ;;  %v601_v53 = vld [vmem:[%s1827_s3 + $0x158] sm:$0xff]  ;;  %v595_v56 = vld [vmem:[%s1827_s3 + $0x128] sm:$0xff] }
  0x46   :  { %692 = vmatprep.subr.mxu1 %v629_v5  ;;  %v600_v54 = vld [vmem:[%s1827_s3 + $0x150] sm:$0xff]  ;;  %v591_v57 = vld [vmem:[%s1827_s3 + $0x108] sm:$0xff]  ;;  %v590_v59 = vld [vmem:[%s1827_s3 + $0x100] sm:$0xff] }
  0x47   :  { %1104 = vmatpush3.xpose.msk.msra.mxu0 %vm121_vm0, %v92_v6  ;;  %v596_v55 = vld [vmem:[%s1827_s3 + $0x130] sm:$0xff]  ;;  %v563_v58 = vld [vmem:[%s1827_s3 + $0x28] sm:$0xff]  ;;  %v586_v61 = vld [vmem:[%s1827_s3 + $0xe0] sm:$0xff] }
  0x48   :  { %1105 = vmatprep.subr.mxu0 %v1180_v2  ;;  %v559_v60 = vld [vmem:[%s1827_s3 + $0x8] sm:$0xff]  ;;  %v558_v62 = vld [vmem:[%s1827_s3] sm:$0xff]  ;;  %v585_v63 = vld [vmem:[%s1827_s3 + $0xd8] sm:$0xff] }
  0x49   :  { %693 = vmatpush1.xpose.msra.mxu1 %v628_v7  ;;  %v581_v0 = vld [vmem:[%s1827_s3 + $0xb8] sm:$0xff]  ;;  %v580_v1 = vld [vmem:[%s1827_s3 + $0xb0] sm:$0xff]  ;;  %v575_v4 = vld [vmem:[%s1827_s3 + $0x88] sm:$0xff] }
  0x4a   :  { %694 = vmatprep.subr.mxu1 %v624_v8  ;;  %v576_v3 = vld [vmem:[%s1827_s3 + $0x90] sm:$0xff]  ;;  %v571_v5 = vld [vmem:[%s1827_s3 + $0x68] sm:$0xff]  ;;  %v570_v6 = vld [vmem:[%s1827_s3 + $0x60] sm:$0xff] }
  0x4b   :  { %1106 = vmatpush3.xpose.msk.msra.mxu0 %vm121_vm0, %v91_v9  ;;  %v566_v7 = vld [vmem:[%s1827_s3 + $0x40] sm:$0xff]  ;;  %v565_v8 = vld [vmem:[%s1827_s3 + $0x38] sm:$0xff] }
  0x4c   :  { %1107 = vmatprep.subr.mxu0 %v1180_v2  ;;  %v561_v9 = vld [vmem:[%s1827_s3 + $0x18] sm:$0xff] }
  0x4d   :  { %695 = vmatpush1.xpose.msra.mxu1 %v623_v10  ;;  %v560_v10 = vld [vmem:[%s1827_s3 + $0x10] sm:$0xff] }
  0x4e   :  { %696 = vmatprep.subr.mxu1 %v619_v11  ;;  %v96_v11 = vlaneseq }
  0x4f   :  { %1108 = vmatpush3.xpose.msk.msra.mxu0 %vm121_vm0, %v90_v12 }
  0x50   :  { %1109 = vmatprep.subr.mxu0 %v1180_v2  ;;  %v1719_v12 = vshrl.u32 %v96_v11, 7 }
  0x51   :  { %697 = vmatpush1.xpose.msra.mxu1 %v618_v13 }
  0x52   :  { %698 = vmatprep.subr.mxu1 %v614_v14  ;;  %v106_v13 = vsub.s32 2, %v1719_v12  ;;  %v98_v14 = vsub.s32 0, %v1719_v12 }
  0x53   :  { %1110 = vmatpush3.xpose.msk.msra.mxu0 %vm121_vm0, %v89_v15  ;;  %v1726_v15 = vld [vmem:[%s1826_s2] sm:$0x1f] }
  0x54   :  { %1111 = vmatprep.subr.mxu0 %v1180_v2 }
  0x55   :  { %699 = vmatpush1.xpose.msra.mxu1 %v613_v16  ;;  %v102_v16 = vsub.s32 1, %v1719_v12 }
  0x56   :  { %700 = vmatprep.subr.mxu1 %v609_v17  ;;  %v110_v17 = vsub.s32 3, %v1719_v12 }
  0x57   :  { %1112 = vmatpush3.xpose.msk.msra.mxu0 %vm121_vm0, %v88_v18  ;;  %v107_v18 = vrot.slane %v1726_v15, %v106_v13 }
  0x58   :  { %1113 = vmatprep.subr.mxu0 %v1180_v2 }
  0x59   :  { %701 = vmatpush1.xpose.msra.mxu1 %v608_v19  ;;  %v99_v19 = vrot.slane %v1726_v15, %v98_v14 }
  0x5a   :  { %702 = vmatprep.subr.mxu1 %v604_v20  ;;  %v103_v20 = vrot.slane %v1726_v15, %v102_v16 }
  0x5b   :  { %1114 = vmatpush3.xpose.msk.msra.mxu0 %vm121_vm0, %v87_v21  ;;  %v111_v21 = vrot.slane %v1726_v15, %v110_v17 }
  0x5c   :  { %1115 = vmatprep.subr.mxu0 %v1180_v2 }
  0x5d   :  { %703 = vmatpush1.xpose.msra.mxu1 %v603_v22 }
  0x5e   :  { %704 = vmatprep.subr.mxu1 %v599_v23 }
  0x5f   :  { %1116 = vmatpush3.xpose.msk.msra.mxu0 %vm121_vm0, %v86_v24 }
  0x60   :  { %760 = vmatprep.subr.mxu0 %v636_v25 }
  0x61   :  { %705 = vmatpush1.xpose.msra.mxu1 %v598_v27 }
  0x62   :  { %706 = vmatprep.subr.mxu1 %v594_v28  ;;  %1118 = vmatmul.mubr.msk.f32.vlgmr.msra.gmra.mxu0 %vm121_vm0, %v1316_v26  ;;  %v588_v26 = vld [vmem:[%s1827_s3 + $0xf0] sm:$0xff] }
  0x63   :  { %761 = vmatpush1.xpose.msra.mxu0 %v635_v29 }
  0x64   :  { %762 = vmatprep.subr.mxu0 %v631_v30 }
  0x65   :  { %707 = vmatpush1.xpose.msra.mxu1 %v593_v31 }
  0x66   :  { %708 = vmatprep.subr.mxu1 %v589_v32 }
  0x67   :  { %763 = vmatpush1.xpose.msra.mxu0 %v630_v33 }
  0x68   :  { %764 = vmatprep.subr.mxu0 %v626_v34 }
  0x69   :  { %709 = vmatpush1.xpose.msra.mxu1 %v588_v26  ;;  %v637_v26 = vld [vmem:[%s1827_s3 + $0x278] sm:$0xff] }
  0x6a   :  { %710 = vmatprep.subr.mxu1 %v584_v35  ;;  %v632_v35 = vld [vmem:[%s1827_s3 + $0x250] sm:$0xff] }
  0x6b   :  { %765 = vmatpush1.xpose.msra.mxu0 %v625_v36  ;;  %v627_v36 = vld [vmem:[%s1827_s3 + $0x228] sm:$0xff] }
  0x6c   :  { %766 = vmatprep.subr.mxu0 %v621_v37  ;;  %v622_v37 = vld [vmem:[%s1827_s3 + $0x200] sm:$0xff] }
  0x6d   :  { %711 = vmatpush1.xpose.msra.mxu1 %v583_v38  ;;  %v617_v38 = vld [vmem:[%s1827_s3 + $0x1d8] sm:$0xff] }
  0x6e   :  { %712 = vmatprep.subr.mxu1 %v579_v39  ;;  %v612_v39 = vld [vmem:[%s1827_s3 + $0x1b0] sm:$0xff] }
  0x6f   :  { %767 = vmatpush1.xpose.msra.mxu0 %v620_v40  ;;  %v607_v40 = vld [vmem:[%s1827_s3 + $0x188] sm:$0xff] }
  0x70   :  { %768 = vmatprep.subr.mxu0 %v616_v41 }
  0x71   :  { %713 = vmatpush1.xpose.msra.mxu1 %v578_v42  ;;  %v602_v42 = vld [vmem:[%s1827_s3 + $0x160] sm:$0xff] }
  0x72   :  { %714 = vmatprep.subr.mxu1 %v574_v43 }
  0x73   :  { %769 = vmatpush1.xpose.msra.mxu0 %v615_v44  ;;  %v597_v44 = vld [vmem:[%s1827_s3 + $0x138] sm:$0xff] }
  0x74   :  { %770 = vmatprep.subr.mxu0 %v611_v45  ;;  %v592_v45 = vld [vmem:[%s1827_s3 + $0x110] sm:$0xff] }
  0x75   :  { %715 = vmatpush1.xpose.msra.mxu1 %v573_v46  ;;  %v587_v46 = vld [vmem:[%s1827_s3 + $0xe8] sm:$0xff] }
  0x76   :  { %716 = vmatprep.subr.mxu1 %v569_v47  ;;  %v582_v47 = vld [vmem:[%s1827_s3 + $0xc0] sm:$0xff] }
  0x77   :  { %771 = vmatpush1.xpose.msra.mxu0 %v610_v48  ;;  %v577_v48 = vld [vmem:[%s1827_s3 + $0x98] sm:$0xff] }
  0x78   :  { %772 = vmatprep.subr.mxu0 %v606_v49  ;;  %v114_v49 = vsub.s32 4, %v1719_v12 }
  0x79   :  { %717 = vmatpush1.xpose.msra.mxu1 %v568_v50  ;;  %v572_v50 = vld [vmem:[%s1827_s3 + $0x70] sm:$0xff] }
  0x7a   :  { %718 = vmatprep.subr.mxu1 %v564_v51  ;;  %v115_v51 = vrot.slane %v1726_v15, %v114_v49 }
  0x7b   :  { %773 = vmatpush1.xpose.msra.mxu0 %v605_v52  ;;  %v567_v52 = vld [vmem:[%s1827_s3 + $0x48] sm:$0xff] }
  0x7c   :  { %774 = vmatprep.subr.mxu0 %v601_v53 }
  0x7d   :  { %719 = vmatpush1.xpose.msra.mxu1 %v563_v58 }
  0x7e   :  { %720 = vmatprep.subr.mxu1 %v559_v60  ;;  %v638_v60 = vld [vmem:[%s1828_s4] sm:$0x1] }
  0x7f   :  { %775 = vmatpush1.xpose.msra.mxu0 %v600_v54  ;;  %v562_v54 = vld [vmem:[%s1827_s3 + $0x20] sm:$0xff]  ;;  %s1158_s3 = scalar_lea.vmem %s908_s12, 16 }
  0x80   :  { %776 = vmatprep.subr.mxu0 %v596_v55  ;;  %p1159_p0 = scmp.ne.s32.totalorder %s908_s12, %s1158_s3  ;;  %p1164_p2 = scmp.lt.s32.totalorder %s1162_s13, %s1158_s3 }
  0x81   :  { %721 = vmatpush1.xpose.msra.mxu1 %v558_v62 }
  0x82   :  { %1120 = vmatprep.subr.mxu1 %v1180_v2  ;;  %p1165_p3 = por %p1164_p2, %p1163_p1 }
  0x83   :  { %777 = vmatpush1.xpose.msra.mxu0 %v595_v56 }
  0x84   :  { %778 = vmatprep.subr.mxu0 %v591_v57  ;;  %p1166_p4 = pnand %p1165_p3, %p1159_p0 }
  0x87   :  { %779 = vmatpush1.xpose.msra.mxu0 %v590_v59 }
  0x88   :  { %780 = vmatprep.subr.mxu0 %v586_v61 }
  0x8b   :  { %781 = vmatpush1.xpose.msra.mxu0 %v585_v63 }
  0x8c   :  { %782 = vmatprep.subr.mxu0 %v581_v0 }
  0x8f   :  { %783 = vmatpush1.xpose.msra.mxu0 %v580_v1 }
  0x90   :  { %784 = vmatprep.subr.mxu0 %v576_v3 }
  0x93   :  { %785 = vmatpush1.xpose.msra.mxu0 %v575_v4 }
  0x94   :  { %786 = vmatprep.subr.mxu0 %v571_v5 }
  0x97   :  { %787 = vmatpush1.xpose.msra.mxu0 %v570_v6 }
  0x98   :  { %788 = vmatprep.subr.mxu0 %v566_v7 }
  0x9b   :  { %789 = vmatpush1.xpose.msra.mxu0 %v565_v8 }
  0x9c   :  { %790 = vmatprep.subr.mxu0 %v561_v9 }
  0x9f   :  { %791 = vmatpush1.xpose.msra.mxu0 %v560_v10 }
 0x102   :  { %v407_v22 = vpop.f32.mrf.mxu0 }
 0x103   :  { %v408_v25 = vadd.f32 %v407_v22, %v99_v19 }
 0x104   :  { %v478_v23 = vpop.f32.mrf.mxu1  ;;  %v409_v27 = vpop.f32.mrf.mxu0 }
 0x105   :  { %v479_v24 = vadd.f32 %v478_v23, %v107_v18  ;;  %v410_v29 = vadd.f32 %v409_v27, %v103_v20  ;;  %v553_v34 = vmax.f32 %v408_v25, 0.0 }
 0x106   :  { %v480_v28 = vpop.f32.mrf.mxu1 }
 0x107   :  { %v481_v30 = vadd.f32 %v480_v28, %v111_v21  ;;  %v555_v31 = vmax.f32 %v479_v24, 0.0  ;;  %v554_v32 = vmax.f32 %v410_v29, 0.0 }
 0x109   :  { %v556_v33 = vmax.f32 %v481_v30, 0.0  ;;  %754 = vmatprep.mubr.f32.mxu1 %v554_v32 }
 0x10a   :  { %755 = vmatmul.mubr.f32.vlgmr.msra.gmra.mxu1 %v553_v34 }
 0x10b   :  { %824 = vmatprep.mubr.f32.mxu0 %v556_v33  ;;  %1121 = vmatpush3.xpose.msk.msra.mxu1 %vm121_vm0, %v637_v26 }
 0x10c   :  { %825 = vmatmul.mubr.f32.vlgmr.msra.gmra.mxu0 %v555_v31  ;;  %1152 = vmatprep.mubr.msk.f32.mxu1 %vm1181_vm1, %v1180_v2 }
 0x10d   :  { %1122 = vmatprep.subr.mxu1 %v1180_v2 }
 0x10f   :  { %1123 = vmatpush3.xpose.msk.msra.mxu1 %vm121_vm0, %v632_v35 }
 0x110   :  { %1124 = vmatprep.subr.mxu1 %v1180_v2 }
 0x113   :  { %1125 = vmatpush3.xpose.msk.msra.mxu1 %vm121_vm0, %v627_v36 }
 0x114   :  { %1126 = vmatprep.subr.mxu1 %v1180_v2 }
 0x117   :  { %1127 = vmatpush3.xpose.msk.msra.mxu1 %vm121_vm0, %v622_v37 }
 0x118   :  { %1128 = vmatprep.subr.mxu1 %v1180_v2 }
 0x11b   :  { %1129 = vmatpush3.xpose.msk.msra.mxu1 %vm121_vm0, %v617_v38 }
 0x11c   :  { %1130 = vmatprep.subr.mxu1 %v1180_v2 }
 0x11f   :  { %1131 = vmatpush3.xpose.msk.msra.mxu1 %vm121_vm0, %v612_v39 }
 0x120   :  { %1132 = vmatprep.subr.mxu1 %v1180_v2 }
 0x122   :  { %v549_v41 = vpop.f32.mrf.mxu0 }
 0x123   :  { %1133 = vmatpush3.xpose.msk.msra.mxu1 %vm121_vm0, %v607_v40  ;;  %v550_v53 = vadd.f32 %v549_v41, %v115_v51 }
 0x124   :  { %1134 = vmatprep.subr.mxu1 %v1180_v2  ;;  %v1119_v43 = vpop.f32.mrf.mxu0 }
 0x125   :  { %v557_v55 = vmax.f32 %v550_v53, 0.0 }
 0x127   :  { %1135 = vmatpush3.xpose.msk.msra.mxu1 %vm121_vm0, %v602_v42 }
 0x128   :  { %1136 = vmatprep.subr.mxu1 %v1180_v2 }
 0x12b   :  { %1137 = vmatpush3.xpose.msk.msra.mxu1 %vm121_vm0, %v597_v44 }
 0x12c   :  { %1138 = vmatprep.subr.mxu1 %v1180_v2 }
 0x12f   :  { %1139 = vmatpush3.xpose.msk.msra.mxu1 %vm121_vm0, %v592_v45 }
 0x130   :  { %1140 = vmatprep.subr.mxu1 %v1180_v2 }
 0x133   :  { %1141 = vmatpush3.xpose.msk.msra.mxu1 %vm121_vm0, %v587_v46 }
 0x134   :  { %1142 = vmatprep.subr.mxu1 %v1180_v2 }
 0x137   :  { %1143 = vmatpush3.xpose.msk.msra.mxu1 %vm121_vm0, %v582_v47 }
 0x138   :  { %1144 = vmatprep.subr.mxu1 %v1180_v2 }
 0x13b   :  { %1145 = vmatpush3.xpose.msk.msra.mxu1 %vm121_vm0, %v577_v48 }
 0x13c   :  { %1146 = vmatprep.subr.mxu1 %v1180_v2 }
 0x13f   :  { %1147 = vmatpush3.xpose.msk.msra.mxu1 %vm121_vm0, %v572_v50 }
 0x140   :  { %1148 = vmatprep.subr.mxu1 %v1180_v2 }
 0x143   :  { %1149 = vmatpush3.xpose.msk.msra.mxu1 %vm121_vm0, %v567_v52 }
 0x144   :  { %1150 = vmatprep.subr.mxu1 %v1180_v2 }
 0x147   :  { %1151 = vmatpush3.xpose.msk.msra.mxu1 %vm121_vm0, %v562_v54 }
 0x14a   :  { %1153 = vmatmul.mubr.msk.f32.vlgmr.msra.gmra.mxu1 %vm121_vm0, %v557_v55 }
 0x1ca   :  { %v756_v56 = vpop.f32.mrf.mxu1 }
 0x1cb   :  { %v757_v61 = vadd.f32 %v756_v56, %v638_v60 }
 0x1cc   :  { %v826_v57 = vpop.f32.mrf.mxu0  ;;  %v758_v58 = vpop.f32.mrf.mxu1 }
 0x1cd   :  { %v827_v2 = vadd.f32 %v826_v57, %v757_v61 }
 0x1ce   :  { %v828_v59 = vpop.f32.mrf.mxu0 }
 0x20a   :  { %v896_v62 = vpop.f32.mrf.mxu1 }
 0x20b   :  { %v897_v63 = vadd.f32 %v896_v62, %v827_v2 }
 0x20c   :  { %v1154_v0 = vpop.f32.mrf.mxu1 }
 0x20d   :  { %900 = vst [vmem:[#allocation2] sm:$0x1] %v897_v63 }
 0x20e   :  { %1169 = shalt.err (!%p1166_p4)
}
 0x20f   :  { %910 = dma.vmem_to_hbm [thread:$0]  %s908_s12, 16, %s1829_s5, [#allocation3]  }
 0x210   :  { %1178 = dma.done.wait [#allocation3], 16  }
 0x211   :  { %1179 = vsyncadd [#allocation3], 4294967280 }
 0x212   :  { %914 = vsyncpa [#allocation3], 1 }

</bundles_post_ra>
